<compile_context>
chip_gen: v7x
topology: tpu7x:2x2x1
jax: 0.10.0
libtpu: 0.0.40
codegen_flags: <defaults>
</compile_context>

<pallas_src>
import functools
import math

import jax
import jax.numpy as jnp
from jax.experimental import pallas as pl
from jax.experimental.pallas import tpu as pltpu

_GELU_C = math.sqrt(2.0 / math.pi)
_MIB = 1024 * 1024


# ---------------------------------------------------------------------------
# Kernels
# ---------------------------------------------------------------------------
def _gelu_f32(h):
    # 0.5*h*(1 + tanh(C*(h + 0.044715*h^3))) == 0.5*h*(1 + tanh(C*h*(1 + 0.044715*h^2)))
    h2 = h * h
    return 0.5 * h * (1.0 + jnp.tanh(_GELU_C * h * (1.0 + 0.044715 * h2)))


def _ffn_kernel_resident(x_ref, w1_ref, b1_ref, w2_ref, b2_ref, o_ref):
    # x_ref: (tm, d_model)   w1_ref: (d_model, d_ff)   b1_ref: (1, d_ff)
    # w2_ref: (d_ff, d_model) b2_ref: (1, d_model)      o_ref: (tm, d_model)
    h = jnp.dot(x_ref[...], w1_ref[...], preferred_element_type=jnp.float32)
    h = h + b1_ref[...].astype(jnp.float32)
    g = _gelu_f32(h)
    # TODO(synk): dropout is identity (inference/eval semantics); a training-mode
    # kernel would draw a mask with pltpu.prng_seed/prng_random_bits.
    out = jnp.dot(g.astype(w2_ref.dtype), w2_ref[...],
                  preferred_element_type=jnp.float32)
    o_ref[...] = (out + b2_ref[...].astype(jnp.float32)).astype(o_ref.dtype)


def _ffn_kernel_chunked(x_ref, w1_ref, b1_ref, w2_ref, b2_ref, o_ref, acc_ref):
    # x_ref: (tm, d_model)   w1_ref: (d_model, tf)   b1_ref: (1, tf)
    # w2_ref: (tf, d_model)   b2_ref: (1, d_model)    o_ref: (tm, d_model)
    # acc_ref: VMEM (tm, d_model) f32 accumulator over the d_ff chunks.
    j = pl.program_id(1)

    @pl.when(j == 0)
    def _init():
        acc_ref[...] = jnp.zeros_like(acc_ref)

    h = jnp.dot(x_ref[...], w1_ref[...], preferred_element_type=jnp.float32)
    h = h + b1_ref[...].astype(jnp.float32)
    g = _gelu_f32(h)
    acc_ref[...] += jnp.dot(g.astype(w2_ref.dtype), w2_ref[...],
                            preferred_element_type=jnp.float32)

    @pl.when(j == pl.num_programs(1) - 1)
    def _finalize():
        o_ref[...] = (acc_ref[...] + b2_ref[...].astype(jnp.float32)).astype(o_ref.dtype)


# ---------------------------------------------------------------------------
# Capability / hardware probes
# ---------------------------------------------------------------------------
@functools.lru_cache(maxsize=None)
def _buffered_supported():
    """One-time probe: can this jax build single-buffer a constant BlockSpec?"""
    try:
        spec = pl.BlockSpec((8, 128), lambda i: (0, 0), pipeline_mode=pl.Buffered(1))
    except Exception:
        return False
    try:
        def _k(x_ref, o_ref):
            o_ref[...] = x_ref[...] * 2.0

        f = pl.pallas_call(
            _k,
            out_shape=jax.ShapeDtypeStruct((8, 128), jnp.float32),
            grid=(1,),
            in_specs=[spec],
            out_specs=pl.BlockSpec((8, 128), lambda i: (0, 0)),
        )
        jax.block_until_ready(f(jnp.zeros((8, 128), jnp.float32)))
        return True
    except Exception:
        return False


@functools.lru_cache(maxsize=None)
def _vmem_cap_bytes():
    """85% of the chip's physical VMEM (generation-aware), conservative fallback."""
    try:
        cap = int(pltpu.get_tpu_info().vmem_capacity_bytes)
        if cap > 0:
            return int(0.85 * cap)
    except Exception:
        pass
    return 64 * _MIB  # safe default (v7x physical size)


def _vmem_limit(est_bytes):
    cap = _vmem_cap_bytes()
    return int(min(max(int(1.25 * est_bytes), 32 * _MIB), cap))


# ---------------------------------------------------------------------------
# Tiling / VMEM estimates
# ---------------------------------------------------------------------------
def _estimate_vmem_resident(tm, d_model, d_ff, x_bytes, w_bytes, w_bufs):
    return (2 * 2 * tm * d_model * x_bytes                                # x + out, double-buffered
            + w_bufs * (2 * d_model * d_ff + d_ff + d_model) * w_bytes    # W1, W2, b1, b2
            + 3 * tm * d_ff * 4)                                          # f32 h/g/tanh temporaries


def _estimate_vmem_chunked(tm, tf, d_model, x_bytes, w_bytes, b2_bufs):
    return (2 * 2 * tm * d_model * x_bytes                                # x + out, double-buffered
            + 2 * (2 * d_model * tf + tf) * w_bytes                       # W1/W2/b1 chunks, double-buffered
            + b2_bufs * d_model * w_bytes                                 # b2
            + tm * d_model * 4                                            # f32 accumulator
            + 3 * tm * tf * 4)                                            # f32 h/g/tanh temporaries


def _choose_tm(M, target):
    """Largest divisor of M <= target, preferring multiples of 8, with >=2 row tiles."""
    target = max(1, min(target, M))
    if M >= 16:
        target = min(target, M // 2)  # >= 2 row tiles -> both v7x TCs get work
    best = None
    for t in range(8, target + 1, 8):
        if M % t == 0:
            best = t
    if best is not None:
        return best
    for d in range(target, 0, -1):
        if M % d == 0:
            return d
    return M


def _choose_tiling(M, d_model, d_ff, x_dtype, w_dtype, tm_req, tf_req):
    x_bytes = jnp.dtype(x_dtype).itemsize
    w_bytes = jnp.dtype(w_dtype).itemsize
    const_buf = 1 if _buffered_supported() else 2
    budget = int(0.9 * _vmem_cap_bytes())

    if tf_req is not None:
        tf = tf_req
        tm = _choose_tm(M, tm_req if tm_req is not None else (256 if tf == d_ff else 512))
        return tm, tf

    # Prefer fully VMEM-resident weights: each weight byte crosses HBM once total.
    tm = _choose_tm(M, tm_req if tm_req is not None else 256)
    if _estimate_vmem_resident(tm, d_model, d_ff, x_bytes, w_bytes, const_buf) <= budget:
        return tm, d_ff

    # Chunked regime: bigger row tile to amortize per-row-tile weight re-streaming.
    tm = _choose_tm(M, tm_req if tm_req is not None else 512)
    candidates = [t for t in range(d_ff - 128, 127, -128) if d_ff % t == 0]
    preferred = [t for t in candidates if t % 256 == 0 and t >= 512]
    ordered = preferred + [t for t in candidates if t not in preferred]
    for tf in ordered:
        if _estimate_vmem_chunked(tm, tf, d_model, x_bytes, w_bytes, const_buf) <= budget:
            return tm, tf
    return tm, (min(candidates) if candidates else d_ff)


# ---------------------------------------------------------------------------
# pallas_call builders
# ---------------------------------------------------------------------------
def _build_resident_call(M, d_model, d_ff, tm, x_dtype, w_dtype, out_dtype):
    n_row = M // tm
    x_bytes = jnp.dtype(x_dtype).itemsize
    w_bytes = jnp.dtype(w_dtype).itemsize

    if _buffered_supported():
        const_kw = {"pipeline_mode": pl.Buffered(1)}
        const_buf = 1
    else:
        const_kw = {}
        const_buf = 2

    in_specs = [
        pl.BlockSpec((tm, d_model), lambda i: (i, 0)),
        pl.BlockSpec((d_model, d_ff), lambda i: (0, 0), **const_kw),
        pl.BlockSpec((1, d_ff), lambda i: (0, 0), **const_kw),
        pl.BlockSpec((d_ff, d_model), lambda i: (0, 0), **const_kw),
        pl.BlockSpec((1, d_model), lambda i: (0, 0), **const_kw),
    ]
    out_specs = pl.BlockSpec((tm, d_model), lambda i: (i, 0))

    est = _estimate_vmem_resident(tm, d_model, d_ff, x_bytes, w_bytes, const_buf)
    flops = 4 * M * d_model * d_ff
    bytes_accessed = (2 * M * d_model * x_bytes
                      + (2 * d_model * d_ff + d_ff + d_model) * w_bytes)

    return pl.pallas_call(
        _ffn_kernel_resident,
        out_shape=jax.ShapeDtypeStruct((M, d_model), out_dtype),
        grid_spec=pltpu.PrefetchScalarGridSpec(
            num_scalar_prefetch=0,
            grid=(n_row,),
            in_specs=in_specs,
            out_specs=out_specs,
        ),
        compiler_params=pltpu.CompilerParams(
            dimension_semantics=("parallel",),
            vmem_limit_bytes=_vmem_limit(est),
        ),
        cost_estimate=pl.CostEstimate(
            flops=flops, transcendentals=M * d_ff, bytes_accessed=bytes_accessed),
    )


def _build_chunked_call(M, d_model, d_ff, tm, tf, x_dtype, w_dtype, out_dtype):
    n_row = M // tm
    n_ff = d_ff // tf
    x_bytes = jnp.dtype(x_dtype).itemsize
    w_bytes = jnp.dtype(w_dtype).itemsize

    if _buffered_supported():
        const_kw = {"pipeline_mode": pl.Buffered(1)}  # b2 only: constant over grid
        b2_buf = 1
    else:
        const_kw = {}
        b2_buf = 2

    in_specs = [
        pl.BlockSpec((tm, d_model), lambda i, j: (i, 0)),
        pl.BlockSpec((d_model, tf), lambda i, j: (0, j)),
        pl.BlockSpec((1, tf), lambda i, j: (0, j)),
        pl.BlockSpec((tf, d_model), lambda i, j: (j, 0)),
        pl.BlockSpec((1, d_model), lambda i, j: (0, 0), **const_kw),
    ]
    out_specs = pl.BlockSpec((tm, d_model), lambda i, j: (i, 0))

    est = _estimate_vmem_chunked(tm, tf, d_model, x_bytes, w_bytes, b2_buf)
    flops = 4 * M * d_model * d_ff
    # Weight chunks are re-streamed once per row tile in this regime.
    bytes_accessed = (2 * M * d_model * x_bytes
                      + n_row * (2 * d_model * d_ff + d_ff + d_model) * w_bytes)

    return pl.pallas_call(
        _ffn_kernel_chunked,
        out_shape=jax.ShapeDtypeStruct((M, d_model), out_dtype),
        grid_spec=pltpu.PrefetchScalarGridSpec(
            num_scalar_prefetch=0,
            grid=(n_row, n_ff),                 # reduction (d_ff) axis last
            in_specs=in_specs,
            out_specs=out_specs,
            scratch_shapes=[pltpu.VMEM((tm, d_model), jnp.float32)],
        ),
        compiler_params=pltpu.CompilerParams(
            dimension_semantics=("parallel", "arbitrary"),
            vmem_limit_bytes=_vmem_limit(est),
        ),
        cost_estimate=pl.CostEstimate(
            flops=flops, transcendentals=M * d_ff, bytes_accessed=bytes_accessed),
    )


# ---------------------------------------------------------------------------
# Public wrapper
# ---------------------------------------------------------------------------
def positionwise_feed_forward(x, w1, b1, w2, b2, *, tm=None, tf=None):
    """x: [B, S, d_model]; w1: [d_model, d_ff]; b1: [d_ff]; w2: [d_ff, d_model]; b2: [d_model].

    tm: row tile over the flattened [B*S, d_model] rows (None = auto).
    tf: d_ff chunk size (None = auto: weights stay fully VMEM-resident when
        they fit the per-chip budget, otherwise streamed in chunks).
    """
    B, S, d_model = x.shape
    d_ff = w1.shape[1]
    M = B * S

    tm, tf = _choose_tiling(M, d_model, d_ff, x.dtype, w1.dtype, tm, tf)
    assert M % tm == 0, "row tile must divide B*S"
    assert d_ff % tf == 0, "d_ff chunk must divide d_ff"
    assert tf == d_ff or tf % 128 == 0, "d_ff chunk must be a multiple of 128"

    x2d = x.reshape(M, d_model)
    b1_2d = b1.reshape(1, d_ff)
    b2_2d = b2.reshape(1, d_model)

    if tf == d_ff:
        call = _build_resident_call(M, d_model, d_ff, tm, x.dtype, w1.dtype, x.dtype)
    else:
        call = _build_chunked_call(M, d_model, d_ff, tm, tf, x.dtype, w1.dtype, x.dtype)

    out = call(x2d, w1, b1_2d, w2, b2_2d)
    return out.reshape(B, S, d_model)


# ---------------------------------------------------------------------------
# Reference + test
# ---------------------------------------------------------------------------
def _reference(x, w1, b1, w2, b2):
    h = jnp.einsum("bsd,df->bsf", x.astype(jnp.float32), w1.astype(jnp.float32))
    h = h + b1.astype(jnp.float32)
    g = 0.5 * h * (1.0 + jnp.tanh(_GELU_C * (h + 0.044715 * h ** 3)))
    return jnp.einsum("bsf,fd->bsd", g, w2.astype(jnp.float32)) + b2.astype(jnp.float32)


def _make_params(key, d_model, d_ff):
    kw1, kb1, kw2, kb2 = jax.random.split(key, 4)
    lim1 = 1.0 / math.sqrt(d_model)
    lim2 = 1.0 / math.sqrt(d_ff)
    w1 = jax.random.uniform(kw1, (d_model, d_ff), jnp.float32, -lim1, lim1)
    b1 = jax.random.uniform(kb1, (d_ff,), jnp.float32, -lim1, lim1)
    w2 = jax.random.uniform(kw2, (d_ff, d_model), jnp.float32, -lim2, lim2)
    b2 = jax.random.uniform(kb2, (d_model,), jnp.float32, -lim2, lim2)
    return w1, b1, w2, b2


if __name__ == "__main__":
    key = jax.random.PRNGKey(0)
    k1, k2, k3, k4 = jax.random.split(key, 4)

    # --- Test 1: module shapes (d_ff = 4*d_model), f32, resident-weights path.
    B, S, d_model = 2, 8, 32
    d_ff = 4 * d_model  # 128
    x = jax.random.normal(k1, (B, S, d_model), dtype=jnp.float32)
    w1, b1, w2, b2 = _make_params(k2, d_model, d_ff)

    y = jax.block_until_ready(positionwise_feed_forward(x, w1, b1, w2, b2))
    y_ref = _reference(x, w1, b1, w2, b2)
    assert y.shape == (B, S, d_model)
    assert jnp.allclose(y, y_ref, atol=1e-5, rtol=1e-5)

    # --- Test 2: same shapes in bf16 (MXU-native operands, f32 accumulation).
    xb, w1b, b1b, w2b, b2b = (t.astype(jnp.bfloat16) for t in (x, w1, b1, w2, b2))
    yb = jax.block_until_ready(positionwise_feed_forward(xb, w1b, b1b, w2b, b2b))
    yb_ref = _reference(xb, w1b, b1b, w2b, b2b)
    assert jnp.allclose(yb.astype(jnp.float32), yb_ref, atol=5e-2, rtol=5e-2)

    # --- Test 3: force the chunked (streamed-weights) path to exercise the
    #     accumulator kernel: d_model=128, d_ff=256, tf=128 -> 2 d_ff chunks.
    d_model2, d_ff2 = 128, 256
    x2 = jax.random.normal(k3, (B, S, d_model2), dtype=jnp.float32)
    w1c, b1c, w2c, b2c = _make_params(k4, d_model2, d_ff2)
    y2 = jax.block_until_ready(
        positionwise_feed_forward(x2, w1c, b1c, w2c, b2c, tf=128))
    y2_ref = _reference(x2, w1c, b1c, w2c, b2c)
    assert jnp.allclose(y2, y2_ref, atol=1e-4, rtol=1e-4)

    print("KERNEL_OK")
</pallas_src>

<mosaic_0001>
module attributes {stable_mosaic.version = 11 : i64} {
  func.func @_k(%arg0: i32, %arg1: memref<8x128xf32, #tpu.memory_space<vmem>>, %arg2: memref<8x128xf32, #tpu.memory_space<vmem>>) attributes {dimension_semantics = [#tpu.dimension_semantics<arbitrary>], iteration_bounds = array<i64: 1>, scalar_prefetch = 0 : i64, scratch_operands = 0 : i64, tpu.core_type = #tpu.core_type<tc>, window_params = [{pipeline_mode = #tpu.pipeline_mode<synchronous>, transform_indices = @transform_0, window_bounds = array<i64: 8, 128>}, {pipeline_mode = #tpu.pipeline_mode<synchronous>, transform_indices = @transform_1, window_bounds = array<i64: 8, 128>}]} {
    %c0 = arith.constant 0 : index
    %c0_0 = arith.constant 0 : index
    %0 = vector.load %arg1[%c0, %c0_0] : memref<8x128xf32, #tpu.memory_space<vmem>>, vector<8x128xf32>
    %cst = arith.constant 2.000000e+00 : f32
    %1 = vector.broadcast %cst : f32 to vector<8x128xf32>
    %2 = arith.mulf %0, %1 : vector<8x128xf32>
    %c0_1 = arith.constant 0 : index
    %c0_2 = arith.constant 0 : index
    %3 = vector.load %arg2[%c0_1, %c0_2] : memref<8x128xf32, #tpu.memory_space<vmem>>, vector<8x128xf32>
    tpu.vector_store %arg2[%c0_1, %c0_2], %2 {strides = array<i32>} : memref<8x128xf32, #tpu.memory_space<vmem>>, vector<8x128xf32>,
    return
  }
  func.func @transform_0(%arg0: i32) -> (i32, i32) {
    %c0_i32 = arith.constant 0 : i32
    %c0_i32_0 = arith.constant 0 : i32
    %c0_i32_1 = arith.constant 0 : i32
    return %c0_i32, %c0_i32_0 : i32, i32
  }
  func.func @transform_1(%arg0: i32) -> (i32, i32) {
    %c0_i32 = arith.constant 0 : i32
    %c0_i32_0 = arith.constant 0 : i32
    %c0_i32_1 = arith.constant 0 : i32
    return %c0_i32, %c0_i32_0 : i32, i32
  }
}

module attributes {stable_mosaic.version = 11 : i64} {
  func.func @_ffn_kernel_resident(%arg0: i32, %arg1: memref<8x32xf32, #tpu.memory_space<vmem>>, %arg2: memref<32x128xf32, #tpu.memory_space<vmem>>, %arg3: memref<1x128xf32, #tpu.memory_space<vmem>>, %arg4: memref<128x32xf32, #tpu.memory_space<vmem>>, %arg5: memref<1x32xf32, #tpu.memory_space<vmem>>, %arg6: memref<8x32xf32, #tpu.memory_space<vmem>>) attributes {dimension_semantics = [#tpu.dimension_semantics<parallel>], iteration_bounds = array<i64: 2>, scalar_prefetch = 0 : i64, scratch_operands = 0 : i64, tpu.core_type = #tpu.core_type<tc>, window_params = [{transform_indices = @transform_0, window_bounds = array<i64: 8, 32>}, {pipeline_mode = #tpu.pipeline_mode<synchronous>, transform_indices = @transform_1, window_bounds = array<i64: 32, 128>}, {pipeline_mode = #tpu.pipeline_mode<synchronous>, transform_indices = @transform_2, window_bounds = array<i64: 1, 128>}, {pipeline_mode = #tpu.pipeline_mode<synchronous>, transform_indices = @transform_3, window_bounds = array<i64: 128, 32>}, {pipeline_mode = #tpu.pipeline_mode<synchronous>, transform_indices = @transform_4, window_bounds = array<i64: 1, 32>}, {transform_indices = @transform_5, window_bounds = array<i64: 8, 32>}]} {
    %c0 = arith.constant 0 : index
    %c0_0 = arith.constant 0 : index
    %0 = vector.load %arg1[%c0, %c0_0] : memref<8x32xf32, #tpu.memory_space<vmem>>, vector<8x32xf32>
    %c0_1 = arith.constant 0 : index
    %c0_2 = arith.constant 0 : index
    %1 = vector.load %arg2[%c0_1, %c0_2] : memref<32x128xf32, #tpu.memory_space<vmem>>, vector<32x128xf32>
    %cst = arith.constant dense<0.000000e+00> : vector<8x128xf32>
    %2 = tpu.matmul %0, %1, %cst {dimension_numbers = #tpu.dot_dimension_numbers<[1], [0], [0], [1], [0, 0, 1, 1], [], []>} : vector<8x32xf32>, vector<32x128xf32>, vector<8x128xf32> -> vector<8x128xf32>
    %c0_3 = arith.constant 0 : index
    %c0_4 = arith.constant 0 : index
    %3 = vector.load %arg3[%c0_3, %c0_4] : memref<1x128xf32, #tpu.memory_space<vmem>>, vector<1x128xf32>
    %4 = vector.broadcast %3 : vector<1x128xf32> to vector<8x128xf32>
    %5 = arith.addf %2, %4 : vector<8x128xf32>
    %6 = arith.mulf %5, %5 : vector<8x128xf32>
    %cst_5 = arith.constant 5.000000e-01 : f32
    %7 = vector.broadcast %cst_5 : f32 to vector<8x128xf32>
    %8 = arith.mulf %7, %5 : vector<8x128xf32>
    %cst_6 = arith.constant 0.797884583 : f32
    %9 = vector.broadcast %cst_6 : f32 to vector<8x128xf32>
    %10 = arith.mulf %9, %5 : vector<8x128xf32>
    %cst_7 = arith.constant 4.471500e-02 : f32
    %11 = vector.broadcast %cst_7 : f32 to vector<8x128xf32>
    %12 = arith.mulf %11, %6 : vector<8x128xf32>
    %cst_8 = arith.constant 1.000000e+00 : f32
    %13 = vector.broadcast %cst_8 : f32 to vector<8x128xf32>
    %14 = arith.addf %13, %12 : vector<8x128xf32>
    %15 = arith.mulf %10, %14 : vector<8x128xf32>
    %16 = math.tanh %15 : vector<8x128xf32>
    %cst_9 = arith.constant 1.000000e+00 : f32
    %17 = vector.broadcast %cst_9 : f32 to vector<8x128xf32>
    %18 = arith.addf %17, %16 : vector<8x128xf32>
    %19 = arith.mulf %8, %18 : vector<8x128xf32>
    %c0_10 = arith.constant 0 : index
    %c0_11 = arith.constant 0 : index
    %20 = vector.load %arg4[%c0_10, %c0_11] : memref<128x32xf32, #tpu.memory_space<vmem>>, vector<128x32xf32>
    %cst_12 = arith.constant dense<0.000000e+00> : vector<8x32xf32>
    %21 = tpu.matmul %19, %20, %cst_12 {dimension_numbers = #tpu.dot_dimension_numbers<[1], [0], [0], [1], [0, 0, 1, 1], [], []>} : vector<8x128xf32>, vector<128x32xf32>, vector<8x32xf32> -> vector<8x32xf32>
    %c0_13 = arith.constant 0 : index
    %c0_14 = arith.constant 0 : index
    %22 = vector.load %arg5[%c0_13, %c0_14] : memref<1x32xf32, #tpu.memory_space<vmem>>, vector<1x32xf32>
    %23 = vector.broadcast %22 : vector<1x32xf32> to vector<8x32xf32>
    %24 = arith.addf %21, %23 : vector<8x32xf32>
    %c0_15 = arith.constant 0 : index
    %c0_16 = arith.constant 0 : index
    %25 = vector.load %arg6[%c0_15, %c0_16] : memref<8x32xf32, #tpu.memory_space<vmem>>, vector<8x32xf32>
    tpu.vector_store %arg6[%c0_15, %c0_16], %24 {strides = array<i32>} : memref<8x32xf32, #tpu.memory_space<vmem>>, vector<8x32xf32>,
    return
  }
  func.func @transform_0(%arg0: i32) -> (i32, i32) {
    %c0_i32 = arith.constant 0 : i32
    %c0_i32_0 = arith.constant 0 : i32
    return %arg0, %c0_i32 : i32, i32
  }
  func.func @transform_1(%arg0: i32) -> (i32, i32) {
    %c0_i32 = arith.constant 0 : i32
    %c0_i32_0 = arith.constant 0 : i32
    %c0_i32_1 = arith.constant 0 : i32
    return %c0_i32, %c0_i32_0 : i32, i32
  }
  func.func @transform_2(%arg0: i32) -> (i32, i32) {
    %c0_i32 = arith.constant 0 : i32
    %c0_i32_0 = arith.constant 0 : i32
    %c0_i32_1 = arith.constant 0 : i32
    return %c0_i32, %c0_i32_0 : i32, i32
  }
  func.func @transform_3(%arg0: i32) -> (i32, i32) {
    %c0_i32 = arith.constant 0 : i32
    %c0_i32_0 = arith.constant 0 : i32
    %c0_i32_1 = arith.constant 0 : i32
    return %c0_i32, %c0_i32_0 : i32, i32
  }
  func.func @transform_4(%arg0: i32) -> (i32, i32) {
    %c0_i32 = arith.constant 0 : i32
    %c0_i32_0 = arith.constant 0 : i32
    %c0_i32_1 = arith.constant 0 : i32
    return %c0_i32, %c0_i32_0 : i32, i32
  }
  func.func @transform_5(%arg0: i32) -> (i32, i32) {
    %c0_i32 = arith.constant 0 : i32
    %c0_i32_0 = arith.constant 0 : i32
    return %arg0, %c0_i32 : i32, i32
  }
}

</mosaic_0001>

<bundles_post_ra>
// kernel: tpu_custom_call.1
= control target key start
LH: loop header
LB: loop body
LE: loop exit
PB: predicated region body
PF: predicated region fallthrough
CT: control target
= control target key end

     0   :  { %6 = vsyncpa [#allocation3], 0  ;;  %s125_s0 = inlined_call_operand.hbm [shape: f32[8,128], index: 0, kind: input, shape index: {}]   ;;  %s126_s1 = inlined_call_operand.hbm [shape: f32[8,128], index: 1, kind: output, shape index: {}]  }
   0x1   :  { %7 = vsyncpa [#allocation4], 0  ;;  %s89_s6 = smov [#allocation2]   ;;  %s41_s10 = scalar_lea.hbm %s125_s0, 128 }
   0x2   :  { %s14_s7 = sshll.u32 %s89_s6, 4  ;;  %p42_p0 = scmp.ne.s32.totalorder %s125_s0, %s41_s10  ;;  %s15_s7 = int_to_ptr.vmem [resolvable:$true] %s14_s7 }
   0x3   :  { %p45_p1 = scmp.lt.u32.totalorder %s41_s10, %s125_s0 }
   0x5   :  { %p47_p2 = pnand %p45_p1, %p42_p0 }
   0x7   :  { %50 = shalt.err (!%p47_p2)
}
   0x8   :  { %s51_s15 = scalar_lea.vmem %s15_s7, 128  ;;  %p56_p4 = scmp.lt.s32.totalorder %s15_s7, %s15_s7 }
   0x9   :  { %p52_p3 = scmp.ne.s32.totalorder %s15_s7, %s51_s15  ;;  %p57_p5 = scmp.lt.s32.totalorder %s51_s15, %s51_s15 }
   0xb   :  { %p58_p6 = por %p57_p5, %p56_p4 }
   0xd   :  { %p59_p7 = pnand %p58_p6, %p52_p3 }
   0xf   :  { %62 = shalt.err (!%p59_p7)
}
  0x10   :  { %17 = dma.hbm_to_vmem [thread:$0]  %s125_s0, 128, %s15_s7, [#allocation3]  }
  0x11   :  { %85 = dma.done.wait [#allocation3], 128  }
  0x12   :  { %86 = vsyncadd [#allocation3], 4294967168  ;;  %s90_s18 = smov [#allocation5]   ;;  %v21_v0 = vld [vmem:[#allocation2] sm:$0xff] }
  0x13   :  { %s30_s19 = sshll.u32 %s90_s18, 4  ;;  %v22_v1 = vmul.f32 2.0, %v21_v0  ;;  %s31_s19 = int_to_ptr.vmem [resolvable:$true] %s30_s19 }
  0x14   :  { %s63_s20 = scalar_lea.vmem %s31_s19, 128  ;;  %p68_p9 = scmp.lt.s32.totalorder %s31_s19, %s31_s19 }
  0x15   :  { %23 = vst [vmem:[#allocation5] sm:$0xff] %v22_v1  ;;  %p64_p8 = scmp.ne.s32.totalorder %s31_s19, %s63_s20  ;;  %p69_p10 = scmp.lt.s32.totalorder %s63_s20, %s63_s20 }
  0x17   :  { %p70_p11 = por %p69_p10, %p68_p9 }
  0x19   :  { %p71_p12 = pnand %p70_p11, %p64_p8 }
  0x1b   :  { %74 = shalt.err (!%p71_p12)
}
  0x1c   :  { %s75_s23 = scalar_lea.hbm %s126_s1, 128 }
  0x1d   :  { %p76_p13 = scmp.ne.s32.totalorder %s126_s1, %s75_s23  ;;  %p79_p0 = scmp.lt.u32.totalorder %s75_s23, %s126_s1 }
  0x1f   :  { %p81_p1 = pnand %p79_p0, %p76_p13 }
  0x21   :  { %84 = shalt.err (!%p81_p1)
}
  0x22   :  { %33 = dma.vmem_to_hbm [thread:$0]  %s31_s19, 128, %s126_s1, [#allocation4]  }
  0x23   :  { %87 = dma.done.wait [#allocation4], 128  }
  0x24   :  { %88 = vsyncadd [#allocation4], 4294967168 }
  0x25   :  { %37 = vsyncpa [#allocation3], 1 }
  0x26   :  { %38 = vsyncpa [#allocation4], 1 }

// kernel: tpu_custom_call.1
= control target key start
LH: loop header
LB: loop body
LE: loop exit
PB: predicated region body
PF: predicated region fallthrough
CT: control target
= control target key end

     0   :  { %10 = vsyncpa [#allocation3], 0  ;;  %s903_s0 = inlined_call_operand.vmem [shape: f32[16,32], index: 0, kind: input, shape index: {}]   ;;  %s904_s1 = inlined_call_operand.vmem [shape: f32[32,128], index: 1, kind: input, shape index: {}]   ;;  %s905_s2 = inlined_call_operand.vmem [shape: f32[1,128], index: 2, kind: input, shape index: {}]   ;;  %s906_s3 = inlined_call_operand.vmem [shape: f32[128,32], index: 3, kind: input, shape index: {}]   ;;  %s907_s4 = inlined_call_operand.vmem [shape: f32[1,32], index: 4, kind: input, shape index: {}]   ;;  %s908_s5 = inlined_call_operand.hbm [shape: f32[16,32], index: 5, kind: output, shape index: {}]  }
   0x1   :  { %12 = vsyncpa [#allocation3 + $0x1], 0  ;;  %s735_s18 = smov 0   ;;  %s737_s19 = smov 0  }
   0x2   :  { %s739_s20 = smov 0   ;;  %s741_s21 = smov 0  }
   0x3 LB: > { %s756_s22 = sadd.s32 4294967295, %s699_s21   ;;  %s482_s23 = sadd.s32 4294967294, %s699_s21   ;;  %s699_s21 = sphi %s741_s21, %s914_s21   ;;  %s695_s20 = sphi %s739_s20, %s913_s20   ;;  %s691_s19 = sphi %s737_s19, %s912_s19   ;;  %s687_s18 = sphi %s735_s18, %s911_s18  }
   0x4   : > { %s760_s24 = sadd.s32 1, %s699_s21   ;;  %s135_s25 = sadd.s32 1, %s695_s20 }
   0x5   : > { %s132_s26 = ssub.s32 %s699_s21, %s760_s24  ;;  %p145_p0 = scmp.ne.s32.totalorder %s695_s20, %s691_s19 }
   0x6   : > { %p133_p1 = scmp.eq.s32.totalorder %s132_s26, 0  ;;  %p146_p2 = scmp.eq.s32.totalorder %s756_s22, 1 }
   0x7   : > { %p151_p3 = scmp.ne.s32.totalorder %s691_s19, %s687_s18  ;;  %p152_p4 = scmp.eq.s32.totalorder %s482_s23, 1 }
   0x8   : > { %s771_s27 = scalar_select %p133_p1, %s695_s20, %s135_s25  }
   0x9   : > { %p773_p5 = por %p146_p2, %p145_p0  ;;  %p777_p6 = por %p152_p4, %p151_p3 }
   0xa   : > { %p485_p7 = scmp.ge.s32.totalorder %s699_s21, 1  ;;  %p189_p8 = scmp.lt.s32.totalorder %s699_s21, 3 }
   0xc   : > { %p190_p9 = pnand %p485_p7, %p189_p8 }
   0xd   : > { %v221_v0 = vld [vmem:[%s904_s1] sm:$0xff] (!%p190_p9)  ;;  %v222_v1 = vld [vmem:[%s904_s1 + $0x8] sm:$0xff] (!%p190_p9)  ;;  %v223_v2 = vld [vmem:[%s904_s1 + $0x10] sm:$0xff] (!%p190_p9)  ;;  %v701_v3 = vmov (!%p190_p9), 0.0|0.0   ;;  %vm702_vm0 = vmmov (!%p190_p9), 0   ;;  %v703_v6 = vmov (!%p190_p9), 0.0  }
   0xe   : > { %193 = sbr.rel (%p190_p9) target bundleno = 491 (0x1eb), region = 40  ;;  %563 = vmatprep.subr.bf16.mxu0 (!%p190_p9), %v701_v3  ;;  %v564_v4 = vpack.c.bf16 (!%p190_p9), %v222_v1, %v221_v0  ;;  %v224_v5 = vld [vmem:[%s904_s1 + $0x18] sm:$0xff] (!%p190_p9)  ;;  %525 = vmatprep.mubr.msk.f32.mxu0 (!%p190_p9), %vm702_vm0, %v703_v6  ;;  %p216_p10 = scmp.lt.s32.totalorder (!%p190_p9), %s756_s22, 1  ;;  %v315_v7 = vld [vmem:[%s906_s3] sm:$0xff] (!%p190_p9)  ;;  %v316_v8 = vld [vmem:[%s906_s3 + $0x8] sm:$0xff] (!%p190_p9)  ;;  %vm232_vm1 = vcmask (!%p190_p9), 261120  }
   0xf   : > { %569 = vmatprep.subr.bf16.mxu1 (!%p190_p9), %v701_v3  ;;  %v570_v9 = vpack.c.bf16 (!%p190_p9), %v316_v8, %v315_v7  ;;  %v317_v10 = vld [vmem:[%s906_s3 + $0x10] sm:$0xff] (!%p190_p9)  ;;  %v318_v11 = vld [vmem:[%s906_s3 + $0x18] sm:$0xff] (!%p190_p9)  ;;  %560 = vmatprep.mubr.msk.f32.mxu1 (!%p190_p9), %vm702_vm0, %v703_v6  ;;  %v567_v12 = vpack.c.bf16 (!%p190_p9), %v224_v5, %v223_v2  ;;  %v319_v15 = vld [vmem:[%s906_s3 + $0x20] sm:$0xff] (!%p190_p9)  ;;  %s213_s26 = sand.u32 (!%p190_p9), 1, %s691_s19   ;;  %s492_s8 = sshll.u32 (!%p190_p9), %s756_s22, 7 }
  0x10   : > { %565 = vmatpush3.bf16.msra.mxu0 (!%p190_p9), %v564_v4  ;;  %v573_v13 = vpack.c.bf16 (!%p190_p9), %v318_v11, %v317_v10  ;;  %v320_v16 = vld [vmem:[%s906_s3 + $0x28] sm:$0xff] (!%p190_p9)  ;;  %v321_v18 = vld [vmem:[%s906_s3 + $0x30] sm:$0xff] (!%p190_p9)  ;;  %v322_v19 = vld [vmem:[%s906_s3 + $0x38] sm:$0xff] (!%p190_p9)  ;;  %s860_s13 = scalar_lea.hbm (!%p190_p9), %s908_s5, %s492_s8  ;;  %s410_s14 = scalar_lea.sflag (!%p190_p9), [#allocation3], %s213_s26 }
  0x11   : > { %566 = vmatprep.subr.bf16.mxu0 (!%p190_p9), %v701_v3  ;;  %571 = vmatpush3.bf16.msra.mxu1 (!%p190_p9), %v570_v9  ;;  %v576_v17 = vpack.c.bf16 (!%p190_p9), %v320_v16, %v319_v15  ;;  %v579_v20 = vpack.c.bf16 (!%p190_p9), %v322_v19, %v321_v18  ;;  %v323_v21 = vld [vmem:[%s906_s3 + $0x40] sm:$0xff] (!%p190_p9)  ;;  %v324_v22 = vld [vmem:[%s906_s3 + $0x48] sm:$0xff] (!%p190_p9)  ;;  %v325_v24 = vld [vmem:[%s906_s3 + $0x50] sm:$0xff] (!%p190_p9) }
  0x12   : > { %572 = vmatprep.subr.bf16.mxu1 (!%p190_p9), %v701_v3  ;;  %v582_v23 = vpack.c.bf16 (!%p190_p9), %v324_v22, %v323_v21  ;;  %v326_v25 = vld [vmem:[%s906_s3 + $0x58] sm:$0xff] (!%p190_p9)  ;;  %v327_v27 = vld [vmem:[%s906_s3 + $0x60] sm:$0xff] (!%p190_p9)  ;;  %v328_v28 = vld [vmem:[%s906_s3 + $0x68] sm:$0xff] (!%p190_p9) }
  0x13   : > { %v585_v26 = vpack.c.bf16 (!%p190_p9), %v326_v25, %v325_v24  ;;  %v588_v29 = vpack.c.bf16 (!%p190_p9), %v328_v28, %v327_v27  ;;  %v329_v30 = vld [vmem:[%s906_s3 + $0x70] sm:$0xff] (!%p190_p9)  ;;  %v330_v31 = vld [vmem:[%s906_s3 + $0x78] sm:$0xff] (!%p190_p9)  ;;  %v488_v33 = vld [vmem:[%s905_s2] ss:$0 sm:$0xff] (!%p190_p9) }
  0x14   : > { %568 = vmatpush3.bf16.msra.mxu0 (!%p190_p9), %v567_v12  ;;  %v591_v32 = vpack.c.bf16 (!%p190_p9), %v330_v31, %v329_v30  ;;  %v490_v46 = vld [vmem:[%s907_s4] ss:$0 sm:$0xff] (!%p190_p9) }
  0x15   : > { %s217_s30 = scalar_select %p216_p10, %s756_s22, 1  ;;  %574 = vmatpush3.bf16.msra.mxu1 %v573_v13 }
  0x16   : > { %575 = vmatprep.subr.bf16.mxu1 %v701_v3  ;;  %s704_s22 = smov [#allocation2]  }
  0x17   : > { %s487_s6 = sshll.u32 %s217_s30, 3  ;;  %s486_s30 = sshll.u32 %s213_s26, 3 }
  0x18   : > { %s219_s9 = scalar_lea.vmem %s903_s0, %s487_s6  ;;  %s641_s16 = sshll.u32 %s704_s22, 4  ;;  %s642_s16 = int_to_ptr.vmem [resolvable:$false] %s641_s16 }
  0x19   : > { %v220_v14 = vld [vmem:[%s219_s9] sm:$0xff]  ;;  %577 = vmatpush3.bf16.msra.mxu1 %v576_v17  ;;  %s215_s9 = scalar_lea.vmem [#allocation2], %s486_s30  ;;  %s643_s17 = scalar_lea.vmem %s642_s16, 256 }
  0x1a   : > { %526 = vmatmul.mubr.msk.f32.vlgmr.msra.gmra.mrb[0].mxu0 %vm232_vm1, %v220_v14  ;;  %578 = vmatprep.subr.bf16.mxu1 %v701_v3  ;;  %s423_s10 = sshll.u32 %s215_s9, 4  ;;  %s862_s10 = int_to_ptr.vmem [resolvable:$true] %s423_s10 }
  0x1b   : > { %s637_s15 = scalar_lea.vmem %s862_s10, 128  ;;  %p644_p0 = scmp.lt.s32.totalorder %s862_s10, %s642_s16 }
  0x1c   : > { %p638_p11 = scmp.ne.s32.totalorder %s862_s10, %s637_s15  ;;  %p645_p1 = scmp.lt.s32.totalorder %s643_s17, %s637_s15 }
  0x1d   : > { %580 = vmatpush3.bf16.msra.mxu1 %v579_v20 }
  0x1e   : > { %581 = vmatprep.subr.bf16.mxu1 %v701_v3  ;;  %p639_p12 = pnand %p638_p11, %p773_p5  ;;  %p646_p2 = por %p645_p1, %p644_p0 }
  0x20   : > { %p640_p13 = pneg %p639_p12 }
  0x21   : > { %583 = vmatpush3.bf16.msra.mxu1 %v582_v23 }
  0x22   : > { %584 = vmatprep.subr.bf16.mxu1 %v701_v3  ;;  %p647_p3 = pnand %p646_p2, %p640_p13 }
  0x25   : > { %586 = vmatpush3.bf16.msra.mxu1 %v585_v26 }
  0x26   : > { %587 = vmatprep.subr.bf16.mxu1 %v701_v3 }
  0x29   : > { %589 = vmatpush3.bf16.msra.mxu1 %v588_v29 }
  0x2a   : > { %590 = vmatprep.subr.bf16.mxu1 %v701_v3 }
  0x2d   : > { %592 = vmatpush3.bf16.msra.mxu1 %v591_v32 }
  0xed   : > { %v302_v34 = vpop.f32.mrb[0].mxu0 }
  0xee   : > { %v303_v35 = vadd.f32 %v488_v33, %v302_v34  ;;  %v527_v36 = vpop.f32.mrb[1].mxu0 }
  0xf0   : > { %v306_v37 = vmul.f32 %v303_v35, %v303_v35  ;;  %v308_v39 = vmul.f32 0.7978846, %v303_v35  ;;  %v307_v43 = vmul.f32 0.5, %v303_v35 }
  0xf2   : > { %v309_v38 = vmul.f32 0.044715, %v306_v37 }
  0xf4   : > { %v310_v40 = vadd.f32 1.0, %v309_v38 }
  0xf6   : > { %v311_v41 = vmul.f32 %v310_v40, %v308_v39 }
  0xf8   : > { %635 = vtanh.f32 %v311_v41 }
 0x102   : > { %v636_v42 = vpop.eup %635 }
 0x103   : > { %v313_v44 = vadd.f32 1.0, %v636_v42 }
 0x105   : > { %v314_v45 = vmul.f32 %v313_v44, %v307_v43 }
 0x107   : > { %561 = vmatmul.mubr.f32.vlgmr.msra.gmra.mrb[0].mxu1 %v314_v45 }
 0x1da   : > { %v404_v47 = vpop.f32.mrb[0].mxu1 }
 0x1db   : > { %v405_v48 = vadd.f32 %v490_v46, %v404_v47  ;;  %v562_v49 = vpop.f32.mrb[1].mxu1 }
 0x1dd   : > { %408 = vst.msk [vmem:[%s215_s9] sm:$0xff] %vm232_vm1, %v405_v48 }
 0x1de   : > { %650 = shalt.err (!%p647_p3)
}
 0x1df   : > { %s651_s23 = scalar_lea.hbm %s860_s13, 128  ;;  %s655_s30 = scalar_lea.hbm %s908_s5, 256 }
 0x1e0   : > { %p652_p4 = scmp.ne.s32.totalorder %s860_s13, %s651_s23  ;;  %p656_p9 = scmp.lt.u32.totalorder %s860_s13, %s908_s5 }
 0x1e1   : > { %p657_p10 = scmp.lt.u32.totalorder %s655_s30, %s651_s23  ;;  %p659_p12 = scmp.lt.u32.totalorder %s651_s23, %s860_s13 }
 0x1e2   : > { %p653_p7 = pnand %p652_p4, %p773_p5 }
 0x1e3   : > { %p658_p11 = por %p657_p10, %p656_p9 }
 0x1e4   : > { %p654_p8 = pneg %p653_p7 }
 0x1e5   : > { %p660_p13 = por %p659_p12, %p658_p11 }
 0x1e7   : > { %p661_p0 = pnand %p660_p13, %p654_p8 }
 0x1e9   : > { %664 = shalt.err (!%p661_p0)
}
 0x1ea   : > { %593 = dma.vmem_to_hbm [thread:$0]  (%p773_p5), %s862_s10, 128, %s860_s13, %s410_s14  }
 0x1eb PF: > { %p599_p1 = scmp.ge.s32.totalorder %s699_s21, 2  ;;  %s435_s8 = sand.u32 1, %s687_s18  }
 0x1ec   : > { %s436_s9 = scalar_lea.sflag [#allocation3], %s435_s8 }
 0x1ed   : > { %p596_p2 = pnand %p599_p1, %p777_p6 }
 0x1ef   : > { %682 = dma.done.wait (!%p596_p2), %s436_s9, 128  }
 0x1f0   : > { %684 = vsyncadd (!%p596_p2), %s436_s9, 4294967168  ;;  %p15_p3 = scmp.ge.s32.totalorder %s760_s24, 4   ;;  %s911_s18 = smov %s691_s19 }
 0x1f1   : > { %s912_s19 = smov %s695_s20  ;;  %s913_s20 = smov %s771_s27 }
 0x1f2   : > { %s914_s21 = smov %s760_s24  ;;  %17 = sbr.rel (!%p15_p3) target bundleno = 3 (0x3), region = 75 }
 0x1f9   :  { %441 = vsyncpa [#allocation3], 1 }
 0x1fa   :  { %443 = vsyncpa [#allocation3 + $0x1], 1 }

</bundles_post_ra>
